<compile_context>
chip_gen: v7x
topology: tpu7x:2x2x1
jax: 0.10.0
libtpu: 0.0.40
codegen_flags: <defaults>
</compile_context>

<pallas_src>
import jax
import jax.numpy as jnp
from jax.experimental import pallas as pl
from jax.experimental.pallas import tpu as pltpu


def _make_kernel(has_halo: bool, hb: int):
    """Build the per-(image, row-tile) kernel body."""

    def kernel(*refs):
        if has_halo:
            x_ref, xu_ref, xd_ref, w_ref, b_ref, s_ref, o_ref = refs
        else:
            x_ref, w_ref, b_ref, s_ref, o_ref = refs

        C, TH, W = x_ref.shape
        Co = w_ref.shape[0]
        W2 = 2 * W

        # ---- halo rows: the image rows just above / below this tile,
        #      replicate-clamped at the image borders.  Shape (C, 1, W).
        if has_halo:
            t = pl.program_id(1)
            last_t = pl.num_programs(1) - 1
            row_above = jnp.where(t == 0, xu_ref[:, 0:1, :], xu_ref[:, hb - 1:hb, :])
            row_below = jnp.where(t == last_t, xd_ref[:, hb - 1:hb, :], xd_ref[:, 0:1, :])
        else:
            # Single tile covers the whole image: borders replicate the tile itself.
            row_above = x_ref[:, 0:1, :]
            row_below = x_ref[:, TH - 1:TH, :]

        w = w_ref[...]                                   # (Co, C)
        b = b_ref[...]                                   # (Co, 1), f32

        # ---- 1x1 conv FIRST (it commutes with the bilinear blend).
        x_flat = x_ref[...].reshape(C, TH * W)
        z = jnp.dot(w, x_flat, preferred_element_type=jnp.float32) + b   # (Co, TH*W)
        z3 = z.reshape(Co, TH, W)
        z_above = (jnp.dot(w, row_above.reshape(C, W),
                           preferred_element_type=jnp.float32) + b).reshape(Co, 1, W)
        z_below = (jnp.dot(w, row_below.reshape(C, W),
                           preferred_element_type=jnp.float32) + b).reshape(Co, 1, W)

        # ---- vertical (H) blend: output row 2i   = 0.75*z[i] + 0.25*z[i-1]
        #                          output row 2i+1 = 0.75*z[i] + 0.25*z[i+1]
        #      (replicate at image borders via the halo rows).
        ridx = jax.lax.broadcasted_iota(jnp.int32, (1, TH, 1), 1)
        z_up = jnp.where(ridx == 0, z_above, pltpu.roll(z3, shift=1, axis=1))
        z_dn = jnp.where(ridx == TH - 1, z_below, pltpu.roll(z3, shift=TH - 1, axis=1))
        even = 0.75 * z3 + 0.25 * z_up                   # -> output rows 2i,   (Co, TH, W)
        odd = 0.75 * z3 + 0.25 * z_dn                    # -> output rows 2i+1, (Co, TH, W)

        # ---- horizontal (W) blend + column interleave in one MXU pass:
        #      s[:, 2j] / s[:, 2j+1] hold the bilinear taps of output columns
        #      2j / 2j+1, so the dot emits columns already interleaved.
        s = s_ref[...]                                   # (W, 2W), f32
        even_h = jnp.dot(even.reshape(Co * TH, W), s,
                         preferred_element_type=jnp.float32).reshape(Co, TH, W2)
        o_ref[:, :, 0:W2] = even_h.astype(o_ref.dtype)   # output rows 2i
        odd_h = jnp.dot(odd.reshape(Co * TH, W), s,
                        preferred_element_type=jnp.float32).reshape(Co, TH, W2)
        o_ref[:, :, W2:2 * W2] = odd_h.astype(o_ref.dtype)   # output rows 2i+1

    return kernel


def _hscale_matrix(W):
    """(W, 2W) tap matrix for scale-2 / align_corners=False bilinear along W.

    Column 2j   = 0.75*x[j] + 0.25*x[max(j-1, 0)]
    Column 2j+1 = 0.75*x[j] + 0.25*x[min(j+1, W-1)]
    (border columns collapse to a single weight of 1.0 == replicate).
    """
    m = jnp.arange(2 * W)
    main = m // 2
    nbr = jnp.clip(jnp.where(m % 2 == 0, main - 1, main + 1), 0, W - 1)
    j = jnp.arange(W)[:, None]
    return (0.75 * (j == main[None, :]) + 0.25 * (j == nbr[None, :])).astype(jnp.float32)


def _tpu_vmem_bytes():
    try:
        info = pltpu.get_tpu_info()
        return int(getattr(info, "vmem_capacity_bytes", 128 * 1024 * 1024))
    except Exception:
        return 128 * 1024 * 1024


def _choose_row_tile(H, W, C, itemsize, vmem_bytes, N):
    """Largest legal row-tile whose x slab fits a generation-aware byte budget."""
    if H % 8 != 0:
        return H                                    # only legal tile is the full image
    budget = max(128 * 1024, vmem_bytes // 40)      # ~3.2 MiB on v5e/v6e, ~1.6 MiB on v7x
    candidates = [d for d in range(8, H + 1, 8) if H % d == 0]
    fitting = [d for d in candidates if C * d * W * itemsize <= budget]
    if not fitting:
        return candidates[0]                        # smallest legal tile (never the full image)
    th = fitting[-1]
    # v7x megacore: with a single image keep >= 2 grid steps so both cores work.
    if N < 2 and th == H and len(fitting) > 1:
        th = fitting[-2]
    return th


def upsampling_forward(x_nchw, r_nchw, w_oc, b_o, *, row_tile=None, use_bf16=False):
    """Forward of USSNet.UpSampling.

    x_nchw: (N, C, H, W); r_nchw: (N, Cr, 2H, 2W); w_oc: (Co, C); b_o: (Co,)
    Returns cat(Conv1x1(bilinear_up2(x)), r) of shape (N, Co + Cr, 2H, 2W).
    use_bf16=True halves kernel HBM traffic (f32 accumulation); default keeps
    PyTorch-f32 numerics.
    """
    N, C, H, W = x_nchw.shape
    Co = w_oc.shape[0]
    io_dtype = jnp.bfloat16 if use_bf16 else jnp.float32
    itemsize = 2 if use_bf16 else 4
    vmem_bytes = _tpu_vmem_bytes()

    TH = (_choose_row_tile(H, W, C, itemsize, vmem_bytes, N)
          if row_tile is None else int(row_tile))
    if H % TH != 0 or (TH != H and TH % 8 != 0):
        raise ValueError(f"invalid row_tile={TH} for H={H}")
    T = H // TH
    HB = 8                           # halo block height (sublane aligned); T>1 implies H%8==0

    x = x_nchw.astype(io_dtype)
    w_kern = w_oc.reshape(Co, C).astype(io_dtype)
    b_kern = b_o.reshape(Co, 1).astype(jnp.float32)
    s_mat = _hscale_matrix(W)

    in_specs = [pl.BlockSpec((None, C, TH, W), lambda n, t: (n, 0, t, 0))]
    operands = [x]
    if T > 1:
        # Halo blocks containing the rows just above / below the tile (clamped).
        in_specs += [
            pl.BlockSpec((None, C, HB, W),
                         lambda n, t: (n, 0, jnp.maximum(t * TH - 1, 0) // HB, 0)),
            pl.BlockSpec((None, C, HB, W),
                         lambda n, t: (n, 0, jnp.minimum((t + 1) * TH, H - 1) // HB, 0)),
        ]
        operands += [x, x]
    in_specs += [
        pl.BlockSpec((Co, C), lambda n, t: (0, 0)),       # weight: VMEM-resident constant
        pl.BlockSpec((Co, 1), lambda n, t: (0, 0)),       # bias
        pl.BlockSpec((W, 2 * W), lambda n, t: (0, 0)),    # horizontal upsample taps
    ]
    operands += [w_kern, b_kern, s_mat]

    # Generation-aware scoped-VMEM limit: 64 MiB on v5e/v6e (128 MiB VMEM),
    # 32 MiB on v7x (64 MiB VMEM per TensorCore).
    vmem_limit = int(max(32, min(vmem_bytes // (2 * 1024 * 1024), 96)) * 1024 * 1024)

    out4 = pl.pallas_call(
        _make_kernel(has_halo=(T > 1), hb=HB),
        out_shape=jax.ShapeDtypeStruct((N, Co, H, 4 * W), io_dtype),
        grid_spec=pltpu.PrefetchScalarGridSpec(
            num_scalar_prefetch=0,
            grid=(N, T),
            in_specs=in_specs,
            out_specs=pl.BlockSpec((None, Co, TH, 4 * W), lambda n, t: (n, 0, t, 0)),
        ),
        compiler_params=pltpu.CompilerParams(
            dimension_semantics=("parallel", "parallel"),
            vmem_limit_bytes=vmem_limit,
        ),
    )(*operands)

    # Copy-free view back to NCHW: (N, Co, H, 4W) == (N, Co, H, 2, 2W) == (N, Co, 2H, 2W).
    y = out4.reshape(N, Co, 2 * H, 2 * W)
    if y.dtype != r_nchw.dtype:
        y = y.astype(r_nchw.dtype)
    # Skip tensor is pure passthrough: concat only, no dtype round trip of r.
    return jnp.concatenate([y, r_nchw], axis=1)


# ---------------- pure-JAX reference (PyTorch semantics) ----------------
def _upsample_bilinear_ref(x):  # NCHW, scale 2, align_corners=False
    _, _, H, W = x.shape

    def coords(L):
        d = jnp.arange(2 * L, dtype=jnp.float32)
        src = jnp.maximum((d + 0.5) / 2.0 - 0.5, 0.0)
        i0 = jnp.floor(src).astype(jnp.int32)
        i1 = jnp.minimum(i0 + 1, L - 1)
        w1 = src - i0.astype(jnp.float32)
        return i0, i1, w1

    h0, h1, wh = coords(H)
    w0, w1, ww = coords(W)
    xh = (x[:, :, h0, :] * (1.0 - wh)[None, None, :, None]
          + x[:, :, h1, :] * wh[None, None, :, None])
    xw = xh[:, :, :, w0] * (1.0 - ww) + xh[:, :, :, w1] * ww
    return xw


def _forward_ref(x, r, w_oc, b_o):
    up = _upsample_bilinear_ref(x)
    y = jnp.einsum('nchw,oc->nohw', up, w_oc) + b_o[None, :, None, None]
    return jnp.concatenate([y, r], axis=1)


if __name__ == "__main__":
    key = jax.random.PRNGKey(0)
    k1, k2, k3, k4 = jax.random.split(key, 4)

    N, C, H, W = 2, 4, 16, 16
    Co = C // 2          # 1x1 conv output channels
    Cr = C // 2          # skip-connection channels (concat partner)

    x = jax.random.normal(k1, (N, C, H, W), dtype=jnp.float32)
    r = jax.random.normal(k2, (N, Cr, 2 * H, 2 * W), dtype=jnp.float32)
    # Deterministic synthetic Conv2d(C, C//2, 1, 1) parameters.
    w_oc = jax.random.normal(k3, (Co, C), dtype=jnp.float32) * 0.1
    b_o = jax.random.normal(k4, (Co,), dtype=jnp.float32) * 0.1

    ref = jax.block_until_ready(_forward_ref(x, r, w_oc, b_o))

    # Default tiling (single row-tile at this small size -> no halo inputs at all).
    out = jax.block_until_ready(upsampling_forward(x, r, w_oc, b_o))
    assert out.shape == (N, Co + Cr, 2 * H, 2 * W), out.shape
    assert jnp.allclose(out, ref, atol=1e-4, rtol=1e-4), \
        float(jnp.max(jnp.abs(out - ref)))

    # Forced spatial tiling (2 row-tiles per image) to exercise the halo path.
    out_tiled = jax.block_until_ready(upsampling_forward(x, r, w_oc, b_o, row_tile=8))
    assert jnp.allclose(out_tiled, ref, atol=1e-4, rtol=1e-4), \
        float(jnp.max(jnp.abs(out_tiled - ref)))

    # bf16 I/O is available via upsampling_forward(..., use_bf16=True) when the
    # caller tolerates bf16 precision (halves kernel HBM bytes; f32 accumulation).
    print("KERNEL_OK")
</pallas_src>

<mosaic_0001>
module attributes {stable_mosaic.version = 11 : i64} {
  func.func @kernel(%arg0: i32, %arg1: i32, %arg2: memref<1x4x16x16xf32, #tpu.memory_space<vmem>>, %arg3: memref<2x4xf32, #tpu.memory_space<vmem>>, %arg4: memref<2x1xf32, #tpu.memory_space<vmem>>, %arg5: memref<16x32xf32, #tpu.memory_space<vmem>>, %arg6: memref<1x2x16x64xf32, #tpu.memory_space<vmem>>) attributes {dimension_semantics = [#tpu.dimension_semantics<parallel>, #tpu.dimension_semantics<parallel>], iteration_bounds = array<i64: 2, 1>, scalar_prefetch = 0 : i64, scratch_operands = 0 : i64, tpu.core_type = #tpu.core_type<tc>, window_params = [{transform_indices = @transform_0, window_bounds = array<i64: 1, 4, 16, 16>}, {pipeline_mode = #tpu.pipeline_mode<synchronous>, transform_indices = @transform_1, window_bounds = array<i64: 2, 4>}, {pipeline_mode = #tpu.pipeline_mode<synchronous>, transform_indices = @transform_2, window_bounds = array<i64: 2, 1>}, {pipeline_mode = #tpu.pipeline_mode<synchronous>, transform_indices = @transform_3, window_bounds = array<i64: 16, 32>}, {transform_indices = @transform_4, window_bounds = array<i64: 1, 2, 16, 64>}]} {
    %c0 = arith.constant 0 : index
    %c0_0 = arith.constant 0 : index
    %c0_1 = arith.constant 0 : index
    %c0_2 = arith.constant 0 : index
    %0 = vector.load %arg2[%c0, %c0_0, %c0_1, %c0_2] : memref<1x4x16x16xf32, #tpu.memory_space<vmem>>, vector<1x4x1x16xf32>
    %1 = vector.shape_cast %0 : vector<1x4x1x16xf32> to vector<4x1x16xf32>
    %c0_3 = arith.constant 0 : index
    %c0_4 = arith.constant 0 : index
    %c15 = arith.constant 15 : index
    %c0_5 = arith.constant 0 : index
    %2 = vector.load %arg2[%c0_3, %c0_4, %c15, %c0_5] : memref<1x4x16x16xf32, #tpu.memory_space<vmem>>, vector<1x4x1x16xf32>
    %3 = vector.shape_cast %2 : vector<1x4x1x16xf32> to vector<4x1x16xf32>
    %c0_6 = arith.constant 0 : index
    %c0_7 = arith.constant 0 : index
    %4 = vector.load %arg3[%c0_6, %c0_7] : memref<2x4xf32, #tpu.memory_space<vmem>>, vector<2x4xf32>
    %c0_8 = arith.constant 0 : index
    %c0_9 = arith.constant 0 : index
    %5 = vector.load %arg4[%c0_8, %c0_9] : memref<2x1xf32, #tpu.memory_space<vmem>>, vector<2x1xf32>
    %c0_10 = arith.constant 0 : index
    %c0_11 = arith.constant 0 : index
    %c0_12 = arith.constant 0 : index
    %c0_13 = arith.constant 0 : index
    %6 = vector.load %arg2[%c0_10, %c0_11, %c0_12, %c0_13] : memref<1x4x16x16xf32, #tpu.memory_space<vmem>>, vector<1x4x16x16xf32>
    %7 = vector.shape_cast %6 : vector<1x4x16x16xf32> to vector<4x16x16xf32>
    %8 = vector.shape_cast %7 : vector<4x16x16xf32> to vector<4x256xf32>
    %cst = arith.constant dense<0.000000e+00> : vector<2x256xf32>
    %9 = tpu.matmul %4, %8, %cst {dimension_numbers = #tpu.dot_dimension_numbers<[1], [0], [0], [1], [0, 0, 1, 1], [], []>} : vector<2x4xf32>, vector<4x256xf32>, vector<2x256xf32> -> vector<2x256xf32>
    %10 = vector.broadcast %5 : vector<2x1xf32> to vector<2x256xf32>
    %11 = arith.addf %9, %10 : vector<2x256xf32>
    %12 = vector.shape_cast %11 : vector<2x256xf32> to vector<2x16x16xf32>
    %13 = vector.shape_cast %1 : vector<4x1x16xf32> to vector<4x16xf32>
    %cst_14 = arith.constant dense<0.000000e+00> : vector<2x16xf32>
    %14 = tpu.matmul %4, %13, %cst_14 {dimension_numbers = #tpu.dot_dimension_numbers<[1], [0], [0], [1], [0, 0, 1, 1], [], []>} : vector<2x4xf32>, vector<4x16xf32>, vector<2x16xf32> -> vector<2x16xf32>
    %15 = vector.broadcast %5 : vector<2x1xf32> to vector<2x16xf32>
    %16 = arith.addf %14, %15 : vector<2x16xf32>
    %17 = vector.shape_cast %16 : vector<2x16xf32> to vector<2x1x16xf32>
    %18 = vector.shape_cast %3 : vector<4x1x16xf32> to vector<4x16xf32>
    %cst_15 = arith.constant dense<0.000000e+00> : vector<2x16xf32>
    %19 = tpu.matmul %4, %18, %cst_15 {dimension_numbers = #tpu.dot_dimension_numbers<[1], [0], [0], [1], [0, 0, 1, 1], [], []>} : vector<2x4xf32>, vector<4x16xf32>, vector<2x16xf32> -> vector<2x16xf32>
    %20 = vector.broadcast %5 : vector<2x1xf32> to vector<2x16xf32>
    %21 = arith.addf %19, %20 : vector<2x16xf32>
    %22 = vector.shape_cast %21 : vector<2x16xf32> to vector<2x1x16xf32>
    %23 = tpu.iota {dimensions = array<i32: 1>} : vector<1x16x1xi32>
    %c0_i32 = arith.constant 0 : i32
    %24 = vector.broadcast %c0_i32 : i32 to vector<1x16x1xi32>
    %25 = arith.cmpi eq, %23, %24 : vector<1x16x1xi32>
    %c1_i32 = arith.constant 1 : i32
    %26 = tpu.dynamic_rotate %12 by %c1_i32 dim 1 : vector<2x16x16xf32>, i32 -> vector<2x16x16xf32>
    %27 = vector.shape_cast %25 : vector<1x16x1xi1> to vector<1x16x1xi1>
    %28 = vector.broadcast %27 : vector<1x16x1xi1> to vector<2x16x16xi1>
    %29 = vector.shape_cast %17 : vector<2x1x16xf32> to vector<2x1x16xf32>
    %30 = vector.broadcast %29 : vector<2x1x16xf32> to vector<2x16x16xf32>
    %31 = arith.select %28, %30, %26 : vector<2x16x16xi1>, vector<2x16x16xf32>
    %c15_i32 = arith.constant 15 : i32
    %32 = vector.broadcast %c15_i32 : i32 to vector<1x16x1xi32>
    %33 = arith.cmpi eq, %23, %32 : vector<1x16x1xi32>
    %c15_i32_16 = arith.constant 15 : i32
    %34 = tpu.dynamic_rotate %12 by %c15_i32_16 dim 1 : vector<2x16x16xf32>, i32 -> vector<2x16x16xf32>
    %35 = vector.shape_cast %33 : vector<1x16x1xi1> to vector<1x16x1xi1>
    %36 = vector.broadcast %35 : vector<1x16x1xi1> to vector<2x16x16xi1>
    %37 = vector.shape_cast %22 : vector<2x1x16xf32> to vector<2x1x16xf32>
    %38 = vector.broadcast %37 : vector<2x1x16xf32> to vector<2x16x16xf32>
    %39 = arith.select %36, %38, %34 : vector<2x16x16xi1>, vector<2x16x16xf32>
    %cst_17 = arith.constant 7.500000e-01 : f32
    %40 = vector.broadcast %cst_17 : f32 to vector<2x16x16xf32>
    %41 = arith.mulf %40, %12 : vector<2x16x16xf32>
    %cst_18 = arith.constant 2.500000e-01 : f32
    %42 = vector.broadcast %cst_18 : f32 to vector<2x16x16xf32>
    %43 = arith.mulf %42, %31 : vector<2x16x16xf32>
    %44 = arith.addf %41, %43 : vector<2x16x16xf32>
    %cst_19 = arith.constant 7.500000e-01 : f32
    %45 = vector.broadcast %cst_19 : f32 to vector<2x16x16xf32>
    %46 = arith.mulf %45, %12 : vector<2x16x16xf32>
    %cst_20 = arith.constant 2.500000e-01 : f32
    %47 = vector.broadcast %cst_20 : f32 to vector<2x16x16xf32>
    %48 = arith.mulf %47, %39 : vector<2x16x16xf32>
    %49 = arith.addf %46, %48 : vector<2x16x16xf32>
    %c0_21 = arith.constant 0 : index
    %c0_22 = arith.constant 0 : index
    %50 = vector.load %arg5[%c0_21, %c0_22] : memref<16x32xf32, #tpu.memory_space<vmem>>, vector<16x32xf32>
    %51 = vector.shape_cast %44 : vector<2x16x16xf32> to vector<32x16xf32>
    %cst_23 = arith.constant dense<0.000000e+00> : vector<32x32xf32>
    %52 = tpu.matmul %51, %50, %cst_23 {dimension_numbers = #tpu.dot_dimension_numbers<[1], [0], [0], [1], [0, 0, 1, 1], [], []>} : vector<32x16xf32>, vector<16x32xf32>, vector<32x32xf32> -> vector<32x32xf32>
    %53 = vector.shape_cast %52 : vector<32x32xf32> to vector<2x16x32xf32>
    %c0_24 = arith.constant 0 : index
    %c0_25 = arith.constant 0 : index
    %c0_26 = arith.constant 0 : index
    %c0_27 = arith.constant 0 : index
    %54 = vector.load %arg6[%c0_24, %c0_25, %c0_26, %c0_27] : memref<1x2x16x64xf32, #tpu.memory_space<vmem>>, vector<1x2x16x32xf32>
    %55 = vector.shape_cast %54 : vector<1x2x16x32xf32> to vector<2x16x32xf32>
    %56 = vector.shape_cast %53 : vector<2x16x32xf32> to vector<1x2x16x32xf32>
    tpu.vector_store %arg6[%c0_24, %c0_25, %c0_26, %c0_27], %56 {strides = array<i32>} : memref<1x2x16x64xf32, #tpu.memory_space<vmem>>, vector<1x2x16x32xf32>,
    %57 = vector.shape_cast %49 : vector<2x16x16xf32> to vector<32x16xf32>
    %cst_28 = arith.constant dense<0.000000e+00> : vector<32x32xf32>
    %58 = tpu.matmul %57, %50, %cst_28 {dimension_numbers = #tpu.dot_dimension_numbers<[1], [0], [0], [1], [0, 0, 1, 1], [], []>} : vector<32x16xf32>, vector<16x32xf32>, vector<32x32xf32> -> vector<32x32xf32>
    %59 = vector.shape_cast %58 : vector<32x32xf32> to vector<2x16x32xf32>
    %c0_29 = arith.constant 0 : index
    %c0_30 = arith.constant 0 : index
    %c0_31 = arith.constant 0 : index
    %c32 = arith.constant 32 : index
    %60 = vector.load %arg6[%c0_29, %c0_30, %c0_31, %c32] : memref<1x2x16x64xf32, #tpu.memory_space<vmem>>, vector<1x2x16x32xf32>
    %61 = vector.shape_cast %60 : vector<1x2x16x32xf32> to vector<2x16x32xf32>
    %62 = vector.shape_cast %59 : vector<2x16x32xf32> to vector<1x2x16x32xf32>
    tpu.vector_store %arg6[%c0_29, %c0_30, %c0_31, %c32], %62 {strides = array<i32>} : memref<1x2x16x64xf32, #tpu.memory_space<vmem>>, vector<1x2x16x32xf32>,
    return
  }
  func.func @transform_0(%arg0: i32, %arg1: i32) -> (i32, i32, i32, i32) {
    %c0_i32 = arith.constant 0 : i32
    %c0_i32_0 = arith.constant 0 : i32
    %c0_i32_1 = arith.constant 0 : i32
    return %arg0, %c0_i32, %arg1, %c0_i32_0 : i32, i32, i32, i32
  }
  func.func @transform_1(%arg0: i32, %arg1: i32) -> (i32, i32) {
    %c0_i32 = arith.constant 0 : i32
    %c0_i32_0 = arith.constant 0 : i32
    %c0_i32_1 = arith.constant 0 : i32
    return %c0_i32, %c0_i32_0 : i32, i32
  }
  func.func @transform_2(%arg0: i32, %arg1: i32) -> (i32, i32) {
    %c0_i32 = arith.constant 0 : i32
    %c0_i32_0 = arith.constant 0 : i32
    %c0_i32_1 = arith.constant 0 : i32
    return %c0_i32, %c0_i32_0 : i32, i32
  }
  func.func @transform_3(%arg0: i32, %arg1: i32) -> (i32, i32) {
    %c0_i32 = arith.constant 0 : i32
    %c0_i32_0 = arith.constant 0 : i32
    %c0_i32_1 = arith.constant 0 : i32
    return %c0_i32, %c0_i32_0 : i32, i32
  }
  func.func @transform_4(%arg0: i32, %arg1: i32) -> (i32, i32, i32, i32) {
    %c0_i32 = arith.constant 0 : i32
    %c0_i32_0 = arith.constant 0 : i32
    %c0_i32_1 = arith.constant 0 : i32
    return %arg0, %c0_i32, %arg1, %c0_i32_0 : i32, i32, i32, i32
  }
}

</mosaic_0001>

<bundles_post_ra>
// kernel: tpu_custom_call.1
= control target key start
LH: loop header
LB: loop body
LE: loop exit
PB: predicated region body
PF: predicated region fallthrough
CT: control target
= control target key end

     0   :  { %9 = vsyncpa [#allocation3], 0  ;;  %s2308_s0 = inlined_call_operand.hbm [shape: f32[2,4,16,16], index: 0, kind: input, shape index: {}]   ;;  %s2309_s1 = inlined_call_operand.hbm [shape: f32[2,4], index: 1, kind: input, shape index: {}]   ;;  %s2310_s2 = inlined_call_operand.hbm [shape: f32[2,1], index: 2, kind: input, shape index: {}]   ;;  %s2311_s3 = inlined_call_operand.hbm [shape: f32[16,32], index: 3, kind: input, shape index: {}]   ;;  %s2312_s4 = inlined_call_operand.hbm [shape: f32[2,2,16,64], index: 4, kind: output, shape index: {}]  }
   0x1   :  { %11 = vsyncpa [#allocation3 + $0x1], 0 }
   0x2   :  { %12 = vsyncpa [#allocation6], 0 }
   0x3   :  { %13 = vsyncpa [#allocation9], 0 }
   0x4   :  { %14 = vsyncpa [#allocation4], 0 }
   0x5   :  { %16 = vsyncpa [#allocation4 + $0x1], 0  ;;  %s1841_s15 = smov 0   ;;  %s1843_s16 = smov 0  }
   0x6   :  { %s1845_s17 = smov 0   ;;  %s1847_s18 = smov 0  }
   0x7   :  { %s1849_s19 = smov 0   ;;  %s1851_s20 = smov 0  }
   0x8 LB: > { %s1385_s21 = sadd.s32 4294967295, %s1792_s20   ;;  %s1386_s22 = sadd.s32 4294967294, %s1792_s20   ;;  %s1792_s20 = sphi %s1851_s20, %s22_s20   ;;  %s1788_s19 = sphi %s1849_s19, %s2336_s19   ;;  %s1784_s18 = sphi %s1847_s18, %s2335_s18   ;;  %s1780_s17 = sphi %s1845_s17, %s2334_s17   ;;  %s1776_s16 = sphi %s1843_s16, %s2333_s16   ;;  %s1772_s15 = sphi %s1841_s15, %s2332_s15  }
   0x9   : > { %p56_p0 = scmp.ne.s32.totalorder %s1776_s16, %s1772_s15  ;;  %p1875_p1 = scmp.eq.s32.totalorder %s1385_s21, 0 }
   0xa   : > { %p1879_p2 = scmp.eq.s32.totalorder %s1385_s21, 1  ;;  %p151_p3 = scmp.eq.s32.totalorder %s1386_s22, 1 }
   0xb   : > { %s2317_s23 = scalar_select %p1875_p1, 1, 0 }
   0xc   : > { %s2318_s24 = scalar_select %p1879_p2, 1, 0 }
   0xd   : > { %p1885_p4 = por %p1875_p1, %p56_p0  ;;  %p1387_p5 = scmp.ge.s32.totalorder %s1792_s20, 1 }
   0xe   : > { %p1890_p6 = por %p151_p3, %p56_p0  ;;  %p158_p7 = scmp.lt.s32.totalorder %s1792_s20, 3 }
   0xf   : > { %s2319_s25 = scalar_select %p1885_p4, 1, 0 }
  0x10   : > { %s2320_s26 = scalar_select %p1890_p6, 1, 0 }
  0x11   : > { %p1895_p8 = pnand %p1387_p5, %p158_p7  ;;  %s1794_s28 = smov [#allocation5]  }
  0x12   : > { %s171_s29 = sshll.u32 %s1794_s28, 4  ;;  %s1795_s30 = smov [#allocation7]   ;;  %s172_s29 = int_to_ptr.vmem [resolvable:$true] %s171_s29 }
  0x13   : > { %s2321_s27 = scalar_select %p1895_p8, 1, 0 }
  0x14   : > { %p1493_p10 = pneg %p1895_p8  ;;  %s182_s5 = sshll.u32 %s1795_s30, 4  ;;  %s1908_s5 = int_to_ptr.vmem [resolvable:$true] %s182_s5 }
  0x15   : > { %s1796_s7 = smov [#allocation8]   ;;  %s1588_s11 = scalar_lea.hbm %s2309_s1, 32 }
  0x16   : > { %p1904_p11 = pnand %p1493_p10, %p1875_p1  ;;  %s192_s8 = sshll.u32 %s1796_s7, 4  ;;  %s1910_s8 = int_to_ptr.vmem [resolvable:$true] %s192_s8 }
  0x17   : > { %p1589_p12 = scmp.ne.s32.totalorder %s2309_s1, %s1588_s11  ;;  %p1595_p5 = scmp.lt.u32.totalorder %s1588_s11, %s2309_s1 }
  0x18   : > { %p1920_p13 = pneg %p1904_p11 }
  0x1a   : > { %p1591_p0 = pnand %p1920_p13, %p1589_p12 }
  0x1c   : > { %p1592_p3 = pneg %p1591_p0 }
  0x1e   : > { %p1597_p7 = pnand %p1595_p5, %p1592_p3 }
  0x20   : > { %1600 = shalt.err (!%p1597_p7)
}
  0x21   : > { %s1601_s28 = scalar_lea.vmem %s172_s29, 32  ;;  %p1609_p1 = scmp.lt.s32.totalorder %s172_s29, %s172_s29 }
  0x22   : > { %p1602_p10 = scmp.ne.s32.totalorder %s172_s29, %s1601_s28  ;;  %p1610_p4 = scmp.lt.s32.totalorder %s1601_s28, %s1601_s28 }
  0x24   : > { %p1604_p9 = pnand %p1602_p10, %p1920_p13  ;;  %p1611_p8 = por %p1610_p4, %p1609_p1 }
  0x26   : > { %p1605_p6 = pneg %p1604_p9 }
  0x28   : > { %p1612_p2 = pnand %p1611_p8, %p1605_p6 }
  0x2a   : > { %1615 = shalt.err (!%p1612_p2)
}
  0x2b   : > { %1496 = dma.hbm_to_vmem [thread:$0]  (!%p1904_p11), %s2309_s1, 32, %s172_s29, [#allocation6]  }
  0x2c   : > { %s1616_s11 = scalar_lea.hbm %s2310_s2, 32 }
  0x2d   : > { %p1617_p9 = scmp.ne.s32.totalorder %s2310_s2, %s1616_s11  ;;  %p1623_p2 = scmp.lt.u32.totalorder %s1616_s11, %s2310_s2 }
  0x2f   : > { %p1619_p12 = pnand %p1617_p9, %p1920_p13 }
  0x31   : > { %p1620_p1 = pneg %p1619_p12 }
  0x33   : > { %p1625_p4 = pnand %p1623_p2, %p1620_p1 }
  0x35   : > { %1628 = shalt.err (!%p1625_p4)
}
  0x36   : > { %s1629_s29 = scalar_lea.vmem %s1908_s5, 32  ;;  %p1637_p3 = scmp.lt.s32.totalorder %s1908_s5, %s1908_s5 }
  0x37   : > { %p1630_p6 = scmp.ne.s32.totalorder %s1908_s5, %s1629_s29  ;;  %p1638_p5 = scmp.lt.s32.totalorder %s1629_s29, %s1629_s29 }
  0x39   : > { %p1632_p8 = pnand %p1630_p6, %p1920_p13  ;;  %p1639_p7 = por %p1638_p5, %p1637_p3 }
  0x3b   : > { %p1633_p0 = pneg %p1632_p8 }
  0x3d   : > { %p1640_p10 = pnand %p1639_p7, %p1633_p0 }
  0x3f   : > { %1643 = shalt.err (!%p1640_p10)
}
  0x40   : > { %1499 = dma.hbm_to_vmem [thread:$0]  (!%p1904_p11), %s2310_s2, 32, %s1908_s5, [#allocation6]  }
  0x41   : > { %s1644_s10 = scalar_lea.hbm %s2311_s3, 256 }
  0x42   : > { %p1645_p9 = scmp.ne.s32.totalorder %s2311_s3, %s1644_s10  ;;  %p1651_p2 = scmp.lt.u32.totalorder %s1644_s10, %s2311_s3 }
  0x44   : > { %p1647_p12 = pnand %p1645_p9, %p1920_p13 }
  0x46   : > { %p1648_p1 = pneg %p1647_p12 }
  0x48   : > { %p1653_p4 = pnand %p1651_p2, %p1648_p1 }
  0x4a   : > { %1656 = shalt.err (!%p1653_p4)
}
  0x4b   : > { %s1657_s5 = scalar_lea.vmem %s1910_s8, 256  ;;  %p1665_p3 = scmp.lt.s32.totalorder %s1910_s8, %s1910_s8 }
  0x4c   : > { %p1658_p6 = scmp.ne.s32.totalorder %s1910_s8, %s1657_s5  ;;  %p1666_p5 = scmp.lt.s32.totalorder %s1657_s5, %s1657_s5 }
  0x4e   : > { %p1660_p8 = pnand %p1658_p6, %p1920_p13  ;;  %p1667_p7 = por %p1666_p5, %p1665_p3 }
  0x50   : > { %p1661_p0 = pneg %p1660_p8 }
  0x52   : > { %p1668_p10 = pnand %p1667_p7, %p1661_p0 }
  0x54   : > { %1671 = shalt.err (!%p1668_p10)
}
  0x55   : > { %s1797_s22 = smov 128   ;;  %s1798_s14 = smov 8  }
  0x56   : > { %1502 = dma.hbm_to_vmem [thread:$0]  (!%p1904_p11), %s2311_s3, 256, %s1910_s8, [#allocation9], %s1797_s22, %s1797_s22, %s1798_s14  }
  0x57   : > { %s43_s30 = sadd.s32 1, %s1780_s17  ;;  %s34_s7 = sadd.s32 1, %s1788_s19 }
  0x58   : > { %p50_p13 = scmp.ne.s32.totalorder %s1780_s17, %s1776_s16  ;;  %p36_p9 = scmp.ge.s32.totalorder %s34_s7, 2 }
  0x59   : > { %p51_p12 = scmp.eq.s32.totalorder %s1792_s20, 0  ;;  %p2324_p1 = scmp.ne.s32.totalorder %s2318_s24, 0 }
  0x5a   : > { %p1514_p4 = scmp.lt.s32.totalorder %s1792_s20, 2  ;;  %s2338_s7 = smov (%p36_p9, %s34_s7), 0 }
  0x5b   : > { %p1992_p2 = por %p2324_p1, %p50_p13  ;;  %p52_p6 = por %p51_p12, %p50_p13 }
  0x5c   : > { %s206_s6 = sand.u32 1, %s1780_s17   ;;  %s38_s10 = ssub.s32 %s1788_s19, %s2338_s7 }
  0x5d   : > { %p41_p8 = scmp.eq.s32.totalorder %s38_s10, 0  ;;  %s1392_s8 = sshll.u32 %s206_s6, 6 }
  0x5e   : > { %s1421_s11 = sshll.u32 %s1788_s19, 10  ;;  %s210_s5 = scalar_lea.vmem [#allocation2], %s1392_s8 }
  0x5f   : > { %s2004_s12 = scalar_select %p41_p8, %s1780_s17, %s43_s30  }
  0x60   : > { %s2009_s24 = scalar_lea.hbm %s2308_s0, %s1421_s11  ;;  %s219_s29 = sshll.u32 %s210_s5, 4  ;;  %s2011_s29 = int_to_ptr.vmem [resolvable:$true] %s219_s29 }
  0x61   : > { %p2015_p11 = pnand %p1514_p4, %p52_p6  ;;  %s2019_s30 = scalar_lea.sflag [#allocation3], %s206_s6 }
  0x62   : > { %s1672_s10 = scalar_lea.hbm %s2009_s24, 1024  ;;  %s1677_s13 = scalar_lea.hbm %s2308_s0, 2048 }
  0x63   : > { %p1673_p0 = scmp.ne.s32.totalorder %s2009_s24, %s1672_s10  ;;  %p1674_p3 = pneg %p2015_p11 }
  0x64   : > { %p1678_p10 = scmp.lt.u32.totalorder %s2009_s24, %s2308_s0  ;;  %p1679_p13 = scmp.lt.u32.totalorder %s1677_s13, %s1672_s10 }
  0x65   : > { %p1675_p5 = pnand %p1674_p3, %p1673_p0  ;;  %p1681_p12 = scmp.lt.u32.totalorder %s1672_s10, %s2009_s24 }
  0x66   : > { %p1680_p9 = por %p1679_p13, %p1678_p10 }
  0x67   : > { %p1676_p7 = pneg %p1675_p5 }
  0x68   : > { %p1682_p1 = por %p1681_p12, %p1680_p9 }
  0x6a   : > { %p1683_p4 = pnand %p1682_p1, %p1676_p7 }
  0x6c   : > { %1686 = shalt.err (!%p1683_p4)
}
  0x6d   : > { %s1687_s6 = scalar_lea.vmem %s2011_s29, 1024  ;;  %s1799_s8 = smov [#allocation2]  }
  0x6e   : > { %p1688_p6 = scmp.ne.s32.totalorder %s2011_s29, %s1687_s6  ;;  %s1692_s11 = sshll.u32 %s1799_s8, 4  ;;  %s1693_s11 = int_to_ptr.vmem [resolvable:$false] %s1692_s11 }
  0x6f   : > { %s1694_s21 = scalar_lea.vmem %s1693_s11, 2048  ;;  %p1695_p5 = scmp.lt.s32.totalorder %s2011_s29, %s1693_s11 }
  0x70   : > { %p1690_p8 = pnand %p1688_p6, %p1674_p3  ;;  %p1696_p10 = scmp.lt.s32.totalorder %s1694_s21, %s1687_s6 }
  0x72   : > { %p1691_p0 = pneg %p1690_p8  ;;  %p1697_p13 = por %p1696_p10, %p1695_p5 }
  0x74   : > { %p1698_p9 = pnand %p1697_p13, %p1691_p0 }
  0x76   : > { %1701 = shalt.err (!%p1698_p9)
}
  0x77   : > { %1506 = dma.hbm_to_vmem [thread:$0]  (!%p2015_p11), %s2009_s24, 1024, %s2011_s29, %s2019_s30, %s1797_s22, %s1797_s22, %s1798_s14  }
  0x78   : > { %p2327_p3 = scmp.ne.s32.totalorder %s2321_s27, 0 }
  0x79   : > { %s2053_s10 = sand.u32 (!%p2327_p3), 1, %s1776_s16   ;;  %p2328_p7 = scmp.ne.s32.totalorder (!%p2327_p3), %s2319_s25, 0 }
  0x7a   : > { %231 = sbr.rel (%p2327_p3) target bundleno = 1012 (0x3f4), region = 36  ;;  %s1396_s13 = sshll.u32 (!%p2327_p3), %s2053_s10, 6 }
  0x7b   : > { %s234_s5 = scalar_lea.sflag (!%p2327_p3), [#allocation3], %s2053_s10  ;;  %s2057_s6 = scalar_lea.vmem (!%p2327_p3), [#allocation2], %s1396_s13 }
  0x81   : > { %1755 = dma.done.wait (%p2328_p7), %s234_s5, 1024  }
  0x82   : > { %1757 = vsyncadd (%p2328_p7), %s234_s5, 4294966272  ;;  %p2329_p11 = scmp.ne.s32.totalorder %s2317_s23, 0 }
  0x84   : > { %1759 = dma.done.wait (%p2329_p11), [#allocation6], 64  }
  0x85   : > { %1761 = vsyncadd (%p2329_p11), [#allocation6], 4294967232 }
  0x86   : > { %1763 = dma.done.wait (%p2329_p11), [#allocation9], 256  }
  0x87   : > { %1765 = vsyncadd (%p2329_p11), [#allocation9], 4294967040  ;;  %v299_v0 = vlaneseq  ;;  %v1800_v1 = vmov 1983009808   ;;  %v1801_v3 = vmov 1934713408  }
  0x88   : > { %v297_v2 = vunpack.c.l.s4 %v1800_v1  ;;  %v329_v4 = vunpack.c.l.s4 %v1801_v3  ;;  %v1802_v6 = vmov 0.0   ;;  %v287_v10 = vld [vmem:[%s2057_s6 + $0x8] sm:$0xff]  ;;  %v289_v11 = vld [vmem:[%s2057_s6 + $0x18] sm:$0xff]  ;;  %v286_v16 = vld [vmem:[%s2057_s6] sm:$0xff]  ;;  %s1803_s23 = smov 64   ;;  %s1804_s25 = smov 32  }
  0x89   : > { %v2071_v5 = vshrl.u32 %v299_v0, 7  ;;  %1439 = vmatprep.subr.mxu1 %v1802_v6  ;;  %587 = vmatprep.mubr.f32.mxu0 %v1802_v6  ;;  %v291_v12 = vld [vmem:[%s2057_s6 + $0x28] sm:$0xff]  ;;  %v293_v13 = vld [vmem:[%s2057_s6 + $0x38] sm:$0xff]  ;;  %v288_v17 = vld [vmem:[%s2057_s6 + $0x10] sm:$0xff]  ;;  %s1805_s27 = smov 16   ;;  %vm743_vm0 = vcmask 1041409  }
  0x8a   : > { %v298_v7 = vunpack.c.0.s8 %v297_v2  ;;  %v330_v8 = vunpack.c.0.s8 %v329_v4  ;;  %v363_v14 = vcombine.high %v287_v10, %v291_v12  ;;  %v362_v15 = vcombine.low %v287_v10, %v291_v12  ;;  %v290_v21 = vld [vmem:[%s2057_s6 + $0x20] sm:$0xff]  ;;  %v292_v22 = vld [vmem:[%s2057_s6 + $0x30] sm:$0xff]  ;;  %v281_v63 = vld [vmem:[%s2057_s6 + $0x1f] sm:$0x1]  ;;  %s1806_s22 = smov 48   ;;  %s1808_s14 = smov 80  }
  0x8b   : > { %v379_v19 = vcombine.high %v289_v11, %v293_v13  ;;  %v378_v20 = vcombine.low %v289_v11, %v293_v13  ;;  %v294_v25 = vcombine.low %v286_v16, %v290_v21  ;;  %v310_v26 = vcombine.low %v288_v17, %v292_v22  ;;  %v277_v49 = vld [vmem:[%s2057_s6 + $0x10] sm:$0x1]  ;;  %v278_v52 = vld [vmem:[%s2057_s6 + $0x20] sm:$0x1]  ;;  %v282_v2 = vld [vmem:[%s2057_s6 + $0x2f] sm:$0x1] }
  0x8c   : > { %v2076_v9 = vsub.s32 %v298_v7, %v2071_v5  ;;  %v2085_v18 = vsub.s32 %v330_v8, %v2071_v5  ;;  %v295_v29 = vcombine.high %v286_v16, %v290_v21  ;;  %v311_v30 = vcombine.high %v288_v17, %v292_v22  ;;  %v276_v55 = vld [vmem:[%s2057_s6] sm:$0x1]  ;;  %v279_v56 = vld [vmem:[%s2057_s6 + $0x30] sm:$0x1]  ;;  %v280_v7 = vld [vmem:[%s2057_s6 + $0xf] sm:$0x1] }
  0x8d   : > { %v742_v53 = vrot.slane %v277_v49, 7  ;;  %v745_v57 = vrot.slane %v278_v52, 6  ;;  %vm746_vm1 = vcmask 1042434   ;;  %v748_v60 = vrot.slane %v279_v56, 5  ;;  %v2147_v4 = vld [vmem:[#allocation5] sm:$0x3] }
  0x8e   : > { %v2090_v23 = vrot.slane %v363_v14, %v2076_v9  ;;  %v370_v24 = vrot.slane %v362_v15, %v2076_v9  ;;  %v2094_v27 = vrot.slane %v379_v19, %v2076_v9  ;;  %v386_v28 = vrot.slane %v378_v20, %v2076_v9  ;;  %v283_v10 = vld [vmem:[%s2057_s6 + $0x3f] sm:$0x1]  ;;  %s1810_s24 = smov 96   ;;  %s1811_s29 = smov 112   ;;  %v285_v21 = vld [vmem:[#allocation7] sm:$0x3] }
  0x8f   : > { %v302_v31 = vrot.slane %v294_v25, %v2076_v9  ;;  %v318_v32 = vrot.slane %v310_v26, %v2076_v9  ;;  %v2102_v36 = vrot.slane %v295_v29, %v2076_v9  ;;  %v325_v38 = vrot.slane %v311_v30, %v2076_v9  ;;  %s1400_s28 = sshll.u32 %s2053_s10, 5  ;;  %s1422_s8 = sshll.u32 %s1784_s18, 9 }
  0x90   : > { %v410_v33 = vcombine.low %v2090_v23, %v2094_v27  ;;  %v395_v34 = vcombine.high %v370_v24, %v386_v28  ;;  %v394_v35 = vcombine.low %v370_v24, %v386_v28  ;;  %v411_v54 = vcombine.high %v2090_v23, %v2094_v27  ;;  %s273_s30 = scalar_lea.vmem [#allocation10], %s1400_s28  ;;  %s2257_s5 = scalar_lea.hbm %s2312_s4, %s1422_s8 }
  0x91   : > { %v327_v37 = vcombine.high %v302_v31, %v318_v32  ;;  %v326_v39 = vcombine.low %v302_v31, %v318_v32  ;;  %v342_v45 = vcombine.low %v2102_v36, %v325_v38  ;;  %v343_v58 = vcombine.high %v2102_v36, %v325_v38  ;;  %s1269_s11 = sshll.u32 %s273_s30, 4  ;;  %s1254_s6 = scalar_lea.sflag [#allocation4], %s2053_s10  ;;  %s2259_s11 = int_to_ptr.vmem [resolvable:$true] %s1269_s11 }
  0x92   : > { %v418_v40 = vrot.slane %v410_v33, %v2085_v18  ;;  %v409_v41 = vrot.slane %v395_v34, %v2085_v18  ;;  %v2108_v42 = vrot.slane %v394_v35, %v2085_v18  ;;  %v744_v59 = vsel %vm743_vm0, %v742_v53, %v276_v55  ;;  %s1702_s18 = scalar_lea.vmem %s2259_s11, 512 }
  0x93   : > { %v341_v43 = vrot.slane %v327_v37, %v2085_v18  ;;  %v2117_v46 = vrot.slane %v326_v39, %v2085_v18  ;;  %v350_v47 = vrot.slane %v342_v45, %v2085_v18  ;;  %vm516_vm2 = vcmask 1043456   ;;  %p1703_p12 = scmp.ne.s32.totalorder %s2259_s11, %s1702_s18 }
  0x94   : > { %471 = vrot.lane.b32.xlu0 %v418_v40, %s1803_s23  ;;  %463 = vrot.lane.b32.xlu1 %v409_v41, %s1804_s25  ;;  %v426_v44 = vcombine.high %v2108_v42, %v1802_v6  ;;  %v427_v50 = vcombine.high %v409_v41, %v1802_v6  ;;  %v428_v61 = vcombine.high %v418_v40, %v1802_v6  ;;  %vm749_vm3 = vcmask 1043459  }
  0x95   : > { %v358_v48 = vcombine.high %v2117_v46, %v1802_v6  ;;  %v359_v51 = vcombine.high %v341_v43, %v1802_v6  ;;  %v747_v62 = vsel %vm746_vm1, %v745_v57, %v744_v59  ;;  %v360_v0 = vcombine.high %v350_v47, %v1802_v6  ;;  %v1033_v59 = vld [vmem:[#allocation8 + $0x8] sm:$0xff]  ;;  %p1704_p1 = pnand %p1703_p12, %p1992_p2 }
  0x96   : > { %v750_v1 = vsel %vm749_vm3, %v748_v60, %v747_v62  ;;  %v850_v3 = vrot.slane %v281_v63, 7  ;;  %vm1807_vm4 = vmmov 0   ;;  %vm512_vm5 = vcmask 31744  }
  0x97   : > { %1440 = vmatpush3.msk.msra.mxu1 %vm516_vm2, %v750_v1  ;;  %1441 = vmatprep.mubr.msk.f32.mxu1 %vm1807_vm4, %v1802_v6  ;;  %v852_v8 = vrot.slane %v282_v2, 6  ;;  %v854_v13 = vrot.slane %v283_v10, 5  ;;  %v357_v14 = vrot.slane %v343_v58, %v2085_v18  ;;  %v425_v15 = vrot.slane %v411_v54, %v2085_v18  ;;  %v1032_v58 = vld [vmem:[#allocation8] sm:$0xff]  ;;  %p1705_p4 = pneg %p1704_p1 }
  0x98   : > { %459 = vrot.lane.b32.xlu0 %v426_v44, %s1805_s27  ;;  %435 = vrot.lane.b32.xlu1 %v341_v43, %s1804_s25  ;;  %v851_v11 = vsel %vm743_vm0, %v850_v3, %v280_v7  ;;  %v1809_v17 = vmov 0   ;;  %vm486_vm6 = vcmask 130048   ;;  %vm488_vm7 = vcmask 261120  }
  0x99   : > { %1442 = vmatmul.mubr.msk.f32.vlgmr.msra.gmra.mrb[0].mxu1 %vm512_vm5, %v2147_v4  ;;  %v853_v12 = vsel %vm746_vm1, %v852_v8, %v851_v11  ;;  %1587 = vset.pattern.permute.xlu0 %v1809_v17  ;;  %v361_v19 = vcombine.high %v357_v14, %v1802_v6  ;;  %v429_v20 = vcombine.high %v425_v15, %v1802_v6  ;;  %vm490_vm8 = vcmask 392192  }
  0x9a   : > { %v855_v16 = vsel %vm749_vm3, %v854_v13, %v853_v12  ;;  %vm492_vm9 = vcmask 523264   ;;  %vm494_vm10 = vcmask 654336   ;;  %vm496_vm11 = vcmask 785408  }
  0x9b   : > { %vm498_vm12 = vcmask 916480   ;;  %v1469_v60 = vpack.c.bf16 %v1033_v59, %v1032_v58  ;;  %v1812_v3 = vmov 1966171168   ;;  %vm989_vm13 = vcmp.lt.s32.totalorder %v2071_v5, 7 }
  0x9c   : > { %443 = vrot.lane.b32.xlu1 %v350_v47, %s1803_s23  ;;  %431 = vrot.lane.b32.xlu0 %v358_v48, %s1805_s27  ;;  %vm960_vm14 = vcmp.lt.s32.totalorder %v2071_v5, 1  ;;  %vm954_vm15 = vcmp.eq.s32.totalorder %v2071_v5, 0  ;;  %vm1248_vm1 = vcmask 523520  }
  0x9d   : > { %1470 = vmatprep.subr.bf16.mxu1 %v1469_v60 }
  0x9e   : > { %1472 = vmatpush3.bf16.msra.mxu1 %v1469_v60 }
  0xa0   : > { %439 = vrot.lane.b32.xlu1 %v359_v51, %s1806_s22  ;;  %467 = vrot.lane.b32.xlu0 %v427_v50, %s1806_s22 }
  0xa4   : > { %447 = vrot.lane.b32.xlu1 %v360_v0, %s1808_s14  ;;  %475 = vrot.lane.b32.xlu0 %v428_v61, %s1808_s14 }
  0xa8   : > { %451 = vrot.lane.b32.xlu1 %v357_v14, %s1810_s24  ;;  %479 = vrot.lane.b32.xlu0 %v425_v15, %s1810_s24 }
  0xac   : > { %455 = vrot.lane.b32.xlu1 %v361_v19, %s1811_s29  ;;  %483 = vrot.lane.b32.xlu0 %v429_v20, %s1811_s29 }
  0xb0   : > { %509 = vperm.xlu0 %1587, %v285_v21  }
 0x106   : > { %v472_v22 = vpop.permute.xlu0 %471  ;;  %v464_v23 = vpop.permute.xlu1 %463 }
 0x10a   : > { %v460_v24 = vpop.permute.xlu0 %459  ;;  %v436_v25 = vpop.permute.xlu1 %435 }
 0x10b   : > { %v500_v30 = vsel %vm486_vm6, %v2108_v42, %v460_v24 }
 0x10c   : > { %v501_v35 = vsel %vm488_vm7, %v500_v30, %v464_v23 }
 0x10e   : > { %v444_v26 = vpop.permute.xlu1 %443  ;;  %v432_v27 = vpop.permute.xlu0 %431 }
 0x10f   : > { %v487_v31 = vsel %vm486_vm6, %v2117_v46, %v432_v27 }
 0x110   : > { %v489_v34 = vsel %vm488_vm7, %v487_v31, %v436_v25 }
 0x112   : > { %v440_v28 = vpop.permute.xlu1 %439  ;;  %v468_v29 = vpop.permute.xlu0 %467 }
 0x113   : > { %v491_v36 = vsel %vm490_vm8, %v489_v34, %v440_v28  ;;  %v502_v37 = vsel %vm490_vm8, %v501_v35, %v468_v29 }
 0x114   : > { %v493_v40 = vsel %vm492_vm9, %v491_v36, %v444_v26  ;;  %v503_v41 = vsel %vm492_vm9, %v502_v37, %v472_v22 }
 0x116   : > { %v448_v32 = vpop.permute.xlu1 %447  ;;  %v476_v33 = vpop.permute.xlu0 %475 }
 0x117   : > { %v495_v42 = vsel %vm494_vm10, %v493_v40, %v448_v32  ;;  %v504_v43 = vsel %vm494_vm10, %v503_v41, %v476_v33  ;;  %v971_v41 = vsub.s32 0, %v2071_v5 }
 0x11a   : > { %v452_v38 = vpop.permute.xlu1 %451  ;;  %v480_v39 = vpop.permute.xlu0 %479 }
 0x11b   : > { %v497_v44 = vsel %vm496_vm11, %v495_v42, %v452_v38  ;;  %v505_v45 = vsel %vm496_vm11, %v504_v43, %v480_v39 }
 0x11e   : > { %v456_v46 = vpop.permute.xlu1 %455  ;;  %v484_v47 = vpop.permute.xlu0 %483 }
 0x11f   : > { %v506_v48 = vsel %vm498_vm12, %v505_v45, %v484_v47  ;;  %v499_v49 = vsel %vm498_vm12, %v497_v44, %v456_v46 }
 0x120   : > { %1401 = vmatprep.subr.msk.mxu0 %vm516_vm2, %v506_v48 }
 0x121   : > { %1402 = vmatpush1.msk.msra.mxu0 %vm516_vm2, %v499_v49 }
 0x122   : > { %1403 = vmatmul.mubr.msk.f32.vlgmr.msra.gmra.mrb[0].mxu0 %vm512_vm5, %v2147_v4  ;;  %1444 = vmatprep.subr.mxu0 %v1802_v6 }
 0x123   : > { %1445 = vmatpush3.msk.msra.mxu0 %vm516_vm2, %v855_v16  ;;  %1446 = vmatprep.mubr.msk.f32.mxu0 %vm1807_vm4, %v1802_v6 }
 0x124   : > { %1474 = vmatprep.subr.bf16.mxu0 %v1469_v60 }
 0x126   : > { %1447 = vmatmul.mubr.msk.f32.vlgmr.msra.gmra.mrb[2].mxu0 %vm512_vm5, %v2147_v4  ;;  %v825_v4 = vunpack.c.l.s4 %v1812_v3 }
 0x127   : > { %1476 = vmatpush3.bf16.msra.mxu0 %v1469_v60 }
 0x128   : > { %v826_v10 = vunpack.c.0.s8 %v825_v4 }
 0x12a   : > { %v829_v15 = vsub.s32 %v826_v10, %v2071_v5 }
 0x12f   : > { %v510_v52 = vpop.permute.xlu0 %509 }
 0x16c   : > { %v819_v50 = vpop.f32.mrb[0].mxu1 }
 0x16d   : > { %v1443_v51 = vpop.f32.mrb[1].mxu1  ;;  %v820_v14 = vadd.f32 %v819_v50, %v510_v52 }
 0x16f   : > { %v830_v24 = vrot.slane %v820_v14, %v829_v15 }
 0x171   : > { %v831_v35 = vcombine.high %v830_v24, %v830_v24  ;;  %v838_v43 = vrot.slane %v830_v24, %v829_v15 }
 0x173   : > { %v845_v47 = vrot.slane %v831_v35, %v829_v15 }
 0x1f5   : > { %v589_v53 = vpop.f32.mrb[0].mxu0 }
 0x1f6   : > { %v590_v54 = vadd.f32 %v589_v53, %v510_v52  ;;  %v591_v55 = vpop.f32.mrb[1].mxu0  ;;  %v953_v53 = vadd.s32 8, %v2071_v5 }
 0x1f7   : > { %v592_v6 = vadd.f32 %v591_v55, %v510_v52 }
 0x1f8   : > { %601 = vrot.lane.b32.xlu0 %v590_v54, %s1808_s14  ;;  %595 = vrot.lane.b32.xlu1 %v590_v54, %s1811_s29  ;;  %vm984_vm0 = vcmp.eq.s32.totalorder %v953_v53, 15 }
 0x1f9   : > { %v924_v56 = vpop.f32.mrb[2].mxu0 }
 0x1fa   : > { %v1448_v57 = vpop.f32.mrb[3].mxu0  ;;  %v925_v16 = vadd.f32 %v924_v56, %v510_v52 }
 0x1fb   : > { %v976_v57 = vrot.slane %v845_v47, %v971_v41 }
 0x1fc   : > { %607 = vrot.lane.b32.xlu0 %v590_v54, %s1806_s22  ;;  %598 = vrot.lane.b32.xlu1 %v590_v54, %s1810_s24  ;;  %v935_v25 = vrot.slane %v925_v16, %v829_v15 }
 0x1fe   : > { %v936_v36 = vcombine.high %v935_v25, %v935_v25  ;;  %v943_v48 = vrot.slane %v935_v25, %v829_v15 }
 0x200   : > { %613 = vrot.lane.b32.xlu0 %v590_v54, %s1805_s27  ;;  %604 = vrot.lane.b32.xlu1 %v590_v54, %s1803_s23  ;;  %v950_v49 = vrot.slane %v936_v36, %v829_v15 }
 0x202   : > { %v1005_v58 = vrot.slane %v950_v49, %v971_v41 }
 0x204   : > { %620 = vrot.lane.b32.xlu0 %v592_v6, %s1810_s24  ;;  %610 = vrot.lane.b32.xlu1 %v590_v54, %s1804_s25 }
 0x208   : > { %626 = vrot.lane.b32.xlu0 %v592_v6, %s1803_s23  ;;  %617 = vrot.lane.b32.xlu1 %v592_v6, %s1811_s29  ;;  %s1813_s23 = smov [#allocation10]  }
 0x20c   : > { %632 = vrot.lane.b32.xlu0 %v592_v6, %s1804_s25  ;;  %623 = vrot.lane.b32.xlu1 %v592_v6, %s1808_s14 }
 0x210   : > { %629 = vrot.lane.b32.xlu1 %v592_v6, %s1806_s22 }
 0x214   : > { %635 = vrot.lane.b32.xlu1 %v592_v6, %s1805_s27 }
 0x26a   : > { %v602_v61 = vpop.permute.xlu0 %601  ;;  %v596_v62 = vpop.permute.xlu1 %595 }
 0x26b   : > { %v646_v21 = vcombine.low %v596_v62, %v602_v61 }
 0x26d   : > { %v653_v31 = vrot.slane %v646_v21, %v2076_v9 }
 0x26e   : > { %v608_v63 = vpop.permute.xlu0 %607  ;;  %v599_v0 = vpop.permute.xlu1 %598 }
 0x26f   : > { %v638_v17 = vcombine.low %v590_v54, %v599_v0  ;;  %v972_v54 = vrot.slane %v838_v43, %v971_v41 }
 0x271   : > { %v645_v26 = vrot.slane %v638_v17, %v2076_v9 }
 0x272   : > { %v614_v1 = vpop.permute.xlu0 %613  ;;  %v605_v2 = vpop.permute.xlu1 %604 }
 0x273   : > { %v662_v19 = vcombine.low %v608_v63, %v614_v1  ;;  %v670_v37 = vcombine.low %v645_v26, %v653_v31 }
 0x275   : > { %v669_v27 = vrot.slane %v662_v19, %v2076_v9  ;;  %v677_v50 = vrot.slane %v670_v37, %v2085_v18 }
 0x276   : > { %v621_v7 = vpop.permute.xlu0 %620  ;;  %v611_v8 = vpop.permute.xlu1 %610 }
 0x277   : > { %v654_v12 = vcombine.low %v605_v2, %v611_v8  ;;  %v688_v30 = vcombine.low %v592_v6, %v621_v7  ;;  %v1001_v6 = vrot.slane %v943_v48, %v971_v41 }
 0x279   : > { %v661_v22 = vrot.slane %v654_v12, %v2076_v9  ;;  %v695_v39 = vrot.slane %v688_v30, %v2076_v9 }
 0x27a   : > { %v618_v11 = vpop.permute.xlu1 %617  ;;  %v627_v13 = vpop.permute.xlu0 %626 }
 0x27b   : > { %v678_v32 = vcombine.low %v661_v22, %v669_v27 }
 0x27d   : > { %v685_v42 = vrot.slane %v678_v32, %v2085_v18 }
 0x27e   : > { %v624_v20 = vpop.permute.xlu1 %623  ;;  %v633_v28 = vpop.permute.xlu0 %632 }
 0x27f   : > { %v696_v23 = vcombine.low %v618_v11, %v624_v20  ;;  %v704_v33 = vcombine.low %v627_v13, %v633_v28  ;;  %v686_v52 = vcombine.low %v677_v50, %v685_v42  ;;  %v687_v59 = vcombine.high %v677_v50, %v685_v42 }
 0x281   : > { %v703_v34 = vrot.slane %v696_v23, %v2076_v9  ;;  %v711_v44 = vrot.slane %v704_v33, %v2076_v9  ;;  %v956_v61 = vrot.slane %v686_v52, 7  ;;  %v985_v62 = vrot.slane %v686_v52, 1 }
 0x282   : > { %v630_v29 = vpop.permute.xlu1 %629  ;;  %v986_v3 = vrot.slane %v687_v59, 1  ;;  %v1012_v7 = vmul.f32 0.75, %v686_v52  ;;  %v1014_v23 = vmul.f32 0.75, %v687_v59 }
 0x283   : > { %v720_v45 = vcombine.low %v695_v39, %v703_v34 }
 0x285   : > { %v727_v55 = vrot.slane %v720_v45, %v2085_v18 }
 0x286   : > { %v636_v38 = vpop.permute.xlu1 %635 }
 0x287   : > { %v712_v40 = vcombine.low %v630_v29, %v636_v38 }
 0x289   : > { %v719_v46 = vrot.slane %v712_v40, %v2076_v9 }
 0x28b   : > { %v728_v51 = vcombine.low %v711_v44, %v719_v46 }
 0x28d   : > { %v735_v56 = vrot.slane %v728_v51, %v2085_v18  ;;  %v957_v18 = vrot.slane %v687_v59, 7 }
 0x28f   : > { %v736_v60 = vcombine.low %v727_v55, %v735_v56  ;;  %v737_v9 = vcombine.high %v727_v55, %v735_v56 }
 0x291   : > { %v958_v63 = vrot.slane %v736_v60, 7  ;;  %v959_v0 = vrot.slane %v737_v9, 7  ;;  %v987_v1 = vrot.slane %v736_v60, 1  ;;  %v988_v2 = vrot.slane %v737_v9, 1 }
 0x292   : > { %v1013_v4 = vmul.f32 0.75, %v736_v60  ;;  %v1015_v35 = vmul.f32 0.75, %v737_v9 }
 0x293   : > { %v990_v8 = vsel %vm989_vm13, %v985_v62, %v987_v1  ;;  %v963_v10 = vsel %vm960_vm14, %v958_v63, %v956_v61  ;;  %v992_v11 = vsel %vm989_vm13, %v987_v1, %v985_v62  ;;  %v961_v12 = vsel %vm960_vm14, %v956_v61, %v958_v63 }
 0x294   : > { %v1024_v13 = vmul.f32 0.25, %v990_v8  ;;  %v979_v14 = vsel %vm954_vm15, %v972_v54, %v963_v10  ;;  %v1009_v15 = vsel %vm984_vm0, %v1001_v6, %v992_v11  ;;  %v1017_v16 = vmul.f32 0.25, %v961_v12 }
 0x295   : > { %v1016_v17 = vmul.f32 0.25, %v979_v14  ;;  %v1025_v19 = vmul.f32 0.25, %v1009_v15  ;;  %v991_v20 = vsel %vm989_vm13, %v986_v3, %v988_v2  ;;  %v964_v21 = vsel %vm960_vm14, %v959_v0, %v957_v18 }
 0x296   : > { %v1028_v22 = vadd.f32 %v1024_v13, %v1012_v7  ;;  %v1026_v24 = vmul.f32 0.25, %v991_v20  ;;  %v981_v25 = vsel %vm954_vm15, %v976_v57, %v964_v21  ;;  %v993_v29 = vsel %vm989_vm13, %v988_v2, %v986_v3 }
 0x297   : > { %v1020_v26 = vadd.f32 %v1016_v17, %v1012_v7  ;;  %v1029_v27 = vadd.f32 %v1025_v19, %v1013_v4  ;;  %v1018_v28 = vmul.f32 0.25, %v981_v25  ;;  %v1021_v30 = vadd.f32 %v1017_v16, %v1013_v4 }
 0x298   : > { %1463 = vmatprep.mubr.msk.f32.mxu0 %vm486_vm6, %v1028_v22  ;;  %v1030_v31 = vadd.f32 %v1026_v24, %v1014_v23  ;;  %v1011_v32 = vsel %vm984_vm0, %v1005_v58, %v993_v29  ;;  %v962_v33 = vsel %vm960_vm14, %v957_v18, %v959_v0 }
 0x299   : > { %1453 = vmatprep.mubr.msk.f32.mxu1 %vm486_vm6, %v1020_v26  ;;  %1464 = vmatmul.mubr.msk.f32.vlgmr.msra.gmra.mrb[4].mxu0 %vm486_vm6, %v1029_v27  ;;  %v1022_v34 = vadd.f32 %v1018_v28, %v1014_v23  ;;  %v1027_v36 = vmul.f32 0.25, %v1011_v32  ;;  %v1019_v37 = vmul.f32 0.25, %v962_v33 }
 0x29a   : > { %1454 = vmatmul.mubr.msk.f32.vlgmr.msra.gmra.mrb[2].mxu1 %vm486_vm6, %v1021_v30  ;;  %1466 = vmatprep.mubr.msk.f32.mxu0 %vm486_vm6, %v1030_v31 }
 0x29b   : > { %1456 = vmatprep.mubr.msk.f32.mxu1 %vm486_vm6, %v1022_v34  ;;  %v1031_v38 = vadd.f32 %v1027_v36, %v1015_v35  ;;  %v1023_v39 = vadd.f32 %v1019_v37, %v1015_v35 }
 0x29d   : > { %1467 = vmatmul.mubr.msk.f32.gmra.mrb[6].mxu0 %vm486_vm6, %v1031_v38 }
 0x29e   : > { %1457 = vmatmul.mubr.msk.f32.gmra.mrb[4].mxu1 %vm486_vm6, %v1023_v39 }
 0x36c   : > { %v1465_v5 = vpop.f32.mrb[4].mxu0 }
 0x36d   : > { %1238 = vrot.lane.b32.xlu1 %v1465_v5, %s1804_s25  ;;  %v1455_v40 = vpop.f32.mrb[2].mxu1  ;;  %v1213_v41 = vpop.f32.mrb[5].mxu0 }
 0x36e   : > { %1132 = vst.msk [vmem:[%s273_s30 + $0x8] sm:$0xff] %vm488_vm7, %v1455_v40  ;;  %1236 = vrot.lane.b32.xlu0 %v1213_v41, %s1804_s25  ;;  %v1112_v42 = vpop.f32.mrb[3].mxu1 }
 0x36f   : > { %1131 = vst.msk [vmem:[%s273_s30] sm:$0xff] %vm488_vm7, %v1112_v42 }
 0x370   : > { %v1468_v43 = vpop.f32.mrb[6].mxu0 }
 0x371   : > { %1242 = vrot.lane.b32.xlu1 %v1468_v43, %s1804_s25  ;;  %v1458_v44 = vpop.f32.mrb[4].mxu1  ;;  %v1223_v45 = vpop.f32.mrb[7].mxu0 }
 0x372   : > { %1134 = vst.msk [vmem:[%s273_s30 + $0x18] sm:$0xff] %vm488_vm7, %v1458_v44  ;;  %1240 = vrot.lane.b32.xlu0 %v1223_v45, %s1804_s25  ;;  %v1122_v46 = vpop.f32.mrb[5].mxu1  ;;  %s1706_s25 = sshll.u32 %s1813_s23, 4  ;;  %s1707_s25 = int_to_ptr.vmem [resolvable:$false] %s1706_s25 }
 0x373   : > { %1133 = vst.msk [vmem:[%s273_s30 + $0x10] sm:$0xff] %vm488_vm7, %v1122_v46  ;;  %s1708_s27 = scalar_lea.vmem %s1707_s25, 1024  ;;  %p1709_p6 = scmp.lt.s32.totalorder %s2259_s11, %s1707_s25 }
 0x374   : > { %p1710_p8 = scmp.lt.s32.totalorder %s1708_s27, %s1702_s18 }
 0x376   : > { %p1711_p0 = por %p1710_p8, %p1709_p6 }
 0x378   : > { %p1712_p5 = pnand %p1711_p0, %p1705_p4 }
 0x3df   : > { %v1239_v47 = vpop.permute.xlu1 %1238 }
 0x3e0   : > { %1250 = vst.msk [vmem:[%s273_s30 + $0x8] sm:$0xff] %vm1248_vm1, %v1239_v47  ;;  %v1237_v48 = vpop.permute.xlu0 %1236 }
 0x3e1   : > { %1249 = vst.msk [vmem:[%s273_s30] sm:$0xff] %vm1248_vm1, %v1237_v48 }
 0x3e3   : > { %v1243_v49 = vpop.permute.xlu1 %1242 }
 0x3e4   : > { %1252 = vst.msk [vmem:[%s273_s30 + $0x18] sm:$0xff] %vm1248_vm1, %v1243_v49  ;;  %v1241_v50 = vpop.permute.xlu0 %1240 }
 0x3e5   : > { %1251 = vst.msk [vmem:[%s273_s30 + $0x10] sm:$0xff] %vm1248_vm1, %v1241_v50 }
 0x3e6   : > { %1715 = shalt.err (!%p1712_p5)
}
 0x3e7   : > { %s1716_s22 = scalar_lea.hbm %s2257_s5, 512  ;;  %s1720_s29 = scalar_lea.hbm %s2312_s4, 1024 }
 0x3e8   : > { %p1717_p10 = scmp.ne.s32.totalorder %s2257_s5, %s1716_s22  ;;  %p1721_p3 = scmp.lt.u32.totalorder %s2257_s5, %s2312_s4 }
 0x3e9   : > { %p1722_p7 = scmp.lt.u32.totalorder %s1720_s29, %s1716_s22  ;;  %p1724_p12 = scmp.lt.u32.totalorder %s1716_s22, %s2257_s5 }
 0x3ea   : > { %p1718_p13 = pnand %p1717_p10, %p1992_p2 }
 0x3eb   : > { %p1723_p11 = por %p1722_p7, %p1721_p3 }
 0x3ec   : > { %p1719_p9 = pneg %p1718_p13 }
 0x3ed   : > { %p1725_p1 = por %p1724_p12, %p1723_p11 }
 0x3ef   : > { %p1726_p4 = pnand %p1725_p1, %p1719_p9 }
 0x3f1   : > { %1729 = shalt.err (!%p1726_p4)
}
 0x3f2   : > { %s1814_s8 = smov 128   ;;  %s1815_s21 = smov 8  }
 0x3f3   : > { %1491 = dma.vmem_to_hbm [thread:$0]  (%p1992_p2), %s2259_s11, 512, %s2257_s5, %s1254_s6, %s1814_s8, %s1814_s8, %s1815_s21  }
 0x3f4 PF: > { %s1284_s13 = sand.u32 1, %s1772_s15   ;;  %p2330_p6 = scmp.ne.s32.totalorder %s2320_s26, 0 }
 0x3f5   : > { %p2331_p8 = scmp.ge.s32.totalorder %s1792_s20, 2  ;;  %s1285_s18 = scalar_lea.sflag [#allocation4], %s1284_s13 }
 0x3f7   : > { %p1508_p0 = pnand %p2331_p8, %p2330_p6 }
 0x3f9   : > { %1767 = dma.done.wait (!%p1508_p0), %s1285_s18, 512  }
 0x3fa   : > { %1769 = vsyncadd (!%p1508_p0), %s1285_s18, 4294966784  ;;  %s22_s20 = sadd.s32 1, %s1792_s20   ;;  %s2332_s15 = smov %s1776_s16 }
 0x3fb   : > { %p19_p5 = scmp.ge.s32.totalorder %s22_s20, 4   ;;  %s2333_s16 = smov %s1780_s17 }
 0x3fc   : > { %s2334_s17 = smov %s2004_s12  ;;  %s2335_s18 = smov %s1788_s19 }
 0x3fd   : > { %s2336_s19 = smov %s2338_s7  ;;  %21 = sbr.rel (!%p19_p5) target bundleno = 8 (0x8), region = 93 }
 0x404   :  { %1290 = vsyncpa [#allocation3], 1 }
 0x405   :  { %1292 = vsyncpa [#allocation3 + $0x1], 1 }
 0x406   :  { %1293 = vsyncpa [#allocation6], 1 }
 0x407   :  { %1294 = vsyncpa [#allocation9], 1 }
 0x408   :  { %1295 = vsyncpa [#allocation4], 1 }
 0x409   :  { %1297 = vsyncpa [#allocation4 + $0x1], 1 }

</bundles_post_ra>
